<compile_context>
chip_gen: v5e
topology: v5e:2x2
jax: 0.10.0
libtpu: 0.0.40
codegen_flags: <defaults>
</compile_context>

<pallas_src>
import functools

import jax
import jax.numpy as jnp
from jax.experimental import pallas as pl
from jax.experimental.pallas import tpu as pltpu

NUM_BOND_TYPE = 6
NUM_BOND_DIRECTION = 3
NUM_ATOM_TYPE = 120
NUM_CHIRALITY_TAG = 3
BN_EPS = 1e-5


def _round_up(x, m):
    return ((x + m - 1) // m) * m


def _pad2(x, rows, cols):
    return jnp.pad(x, ((0, rows - x.shape[0]), (0, cols - x.shape[1])))


def _pad1(v, n):
    return jnp.pad(v, (0, n - v.shape[0]))


# ---------------------------------------------------------------------------
# Fused Pallas kernel: one GIN layer per grid step (message passing + MLP +
# BatchNorm (+ReLU)); h carried across steps in VMEM scratch.
# ---------------------------------------------------------------------------
def _gin_layer_kernel(h0_ref, a_ref, eagg_ref, w1_ref, w2_ref, small_ref,
                      out_ref, h_scr, *, num_layer, n_valid, d_pad, jk_last,
                      mxu_dtype):
    l = pl.program_id(0)

    @pl.when(l == 0)
    def _():
        h_scr[...] = h0_ref[...]

    n_pad = h_scr.shape[0]
    # mask of the real (un-padded) node rows, used for BatchNorm statistics
    row_ids = jax.lax.broadcasted_iota(jnp.int32, (n_pad, 1), 0)
    row_mask = (row_ids < n_valid).astype(jnp.float32)            # [N_pad, 1]
    inv_n = jnp.float32(1.0 / n_valid)

    h = h_scr[...]                                                # [N_pad, D_pad] f32
    # message passing ("add" aggr, self-loops folded into A):
    #   aggr = A @ h + segment_sum(edge_emb, tgt)
    aggr = jnp.dot(a_ref[...], h.astype(mxu_dtype),
                   preferred_element_type=jnp.float32)
    aggr = aggr + eagg_ref[0].astype(jnp.float32)

    sm = small_ref[0]                                             # [8, H_pad] f32
    # MLP: Linear(D, 2D) -> ReLU -> Linear(2D, D)
    z1 = jnp.dot(aggr.astype(mxu_dtype), w1_ref[0],
                 preferred_element_type=jnp.float32) + sm[0:1, :]
    z1 = jnp.maximum(z1, 0.0)
    z2 = jnp.dot(z1.astype(mxu_dtype), w2_ref[0],
                 preferred_element_type=jnp.float32) + sm[1:2, :d_pad]

    # BatchNorm1d (training-mode batch stats, biased var) — two-pass to avoid
    # E[x^2] - E[x]^2 cancellation; padded rows masked out of the statistics.
    z2m = z2 * row_mask
    mean = jnp.sum(z2m, axis=0, keepdims=True) * inv_n
    cen = (z2 - mean) * row_mask
    var = jnp.sum(cen * cen, axis=0, keepdims=True) * inv_n
    hn = (z2 - mean) * jax.lax.rsqrt(var + BN_EPS)
    hn = hn * sm[2:3, :d_pad] + sm[3:4, :d_pad]                   # gamma / beta

    is_last = l == num_layer - 1
    hn_act = jnp.where(is_last, hn, jnp.maximum(hn, 0.0))         # ReLU except last

    h_scr[...] = hn_act
    if jk_last:
        # constant output index_map: stays resident, HBM writeback once at grid end
        out_ref[...] = hn_act
    else:
        out_ref[0] = hn_act


def _vmem_limit_bytes(n_pad, d_pad, h_pad, jk_last, mxu_bytes):
    f32 = 4
    resident = n_pad * n_pad * mxu_bytes + 2 * n_pad * d_pad * f32     # A + h0 + h scratch
    out_blk = n_pad * d_pad * f32
    out = out_blk if jk_last else 2 * out_blk                          # double-buffered
    per_layer = ((n_pad * d_pad + d_pad * h_pad + h_pad * d_pad) * mxu_bytes
                 + 8 * h_pad * f32)
    need = resident + out + 2 * per_layer                              # 2-deep pipeline
    need = int(need * 1.3) + (6 << 20)                                 # compiler headroom
    try:
        phys = pltpu.get_tpu_info().vmem_capacity_bytes
    except Exception:
        phys = 64 << 20                                                # v7x-safe fallback
    cap = min(phys - (8 << 20), 100 << 20)
    return int(max(min(need, cap), 16 << 20))


def _fused_gin_pallas(h0_pad, a_pad, eagg, w1, w2, small, *, num_layer,
                      n_valid, jk_last, mxu_dtype):
    n_pad, d_pad = h0_pad.shape
    h_pad = w1.shape[2]
    mxu_bytes = jnp.dtype(mxu_dtype).itemsize

    kern = functools.partial(_gin_layer_kernel, num_layer=num_layer,
                             n_valid=n_valid, d_pad=d_pad, jk_last=jk_last,
                             mxu_dtype=mxu_dtype)

    if jk_last:
        out_shape = jax.ShapeDtypeStruct((n_pad, d_pad), jnp.float32)
        out_spec = pl.BlockSpec((n_pad, d_pad), lambda l: (0, 0))
        out_elems = n_pad * d_pad
    else:
        out_shape = jax.ShapeDtypeStruct((num_layer, n_pad, d_pad), jnp.float32)
        out_spec = pl.BlockSpec((1, n_pad, d_pad), lambda l: (l, 0, 0))
        out_elems = num_layer * n_pad * d_pad

    inputs = (h0_pad, a_pad, eagg, w1, w2, small)
    flops = num_layer * 2 * (n_pad * n_pad * d_pad
                             + n_pad * d_pad * h_pad
                             + n_pad * h_pad * d_pad)
    bytes_accessed = (sum(int(x.size) * x.dtype.itemsize for x in inputs)
                      + out_elems * 4)

    grid_spec = pltpu.PrefetchScalarGridSpec(
        num_scalar_prefetch=0,
        grid=(num_layer,),
        in_specs=[
            pl.BlockSpec((n_pad, d_pad), lambda l: (0, 0)),         # h0 (resident)
            pl.BlockSpec((n_pad, n_pad), lambda l: (0, 0)),         # A  (resident)
            pl.BlockSpec((1, n_pad, d_pad), lambda l: (l, 0, 0)),   # eagg (per layer)
            pl.BlockSpec((1, d_pad, h_pad), lambda l: (l, 0, 0)),   # w1
            pl.BlockSpec((1, h_pad, d_pad), lambda l: (l, 0, 0)),   # w2
            pl.BlockSpec((1, 8, h_pad), lambda l: (l, 0, 0)),       # b1/b2/gamma/beta
        ],
        out_specs=out_spec,
        scratch_shapes=[pltpu.VMEM((n_pad, d_pad), jnp.float32)],   # carried h
    )
    return pl.pallas_call(
        kern,
        out_shape=out_shape,
        grid_spec=grid_spec,
        compiler_params=pltpu.CompilerParams(
            dimension_semantics=("arbitrary",),
            vmem_limit_bytes=_vmem_limit_bytes(n_pad, d_pad, h_pad, jk_last,
                                               mxu_bytes)),
        cost_estimate=pl.CostEstimate(flops=flops,
                                      transcendentals=num_layer * d_pad,
                                      bytes_accessed=bytes_accessed),
    )(*inputs)


# ---------------------------------------------------------------------------
# Parameter construction (deterministic, xavier-uniform like the torch init)
# ---------------------------------------------------------------------------
def xavier_uniform(key, shape):
    fan_in, fan_out = shape
    bound = (6.0 / (fan_in + fan_out)) ** 0.5
    return jax.random.uniform(key, shape, jnp.float32, -bound, bound)


def make_params(key, num_layer, emb_dim):
    keys = jax.random.split(key, 2 + 6 * num_layer)
    params = {
        "xe1": xavier_uniform(keys[0], (NUM_ATOM_TYPE, emb_dim)),
        "xe2": xavier_uniform(keys[1], (NUM_CHIRALITY_TAG, emb_dim)),
        "layers": [],
    }
    for l in range(num_layer):
        k = keys[2 + 6 * l: 2 + 6 * (l + 1)]
        params["layers"].append({
            "ee1": xavier_uniform(k[0], (NUM_BOND_TYPE, emb_dim)),
            "ee2": xavier_uniform(k[1], (NUM_BOND_DIRECTION, emb_dim)),
            "w1": xavier_uniform(k[2], (emb_dim, 2 * emb_dim)),
            "b1": jax.random.uniform(k[3], (2 * emb_dim,), jnp.float32, -0.01, 0.01),
            "w2": xavier_uniform(k[4], (2 * emb_dim, emb_dim)),
            "b2": jax.random.uniform(k[5], (emb_dim,), jnp.float32, -0.01, 0.01),
            "gamma": jnp.ones((emb_dim,), jnp.float32),
            "beta": jnp.zeros((emb_dim,), jnp.float32),
        })
    return params


# ---------------------------------------------------------------------------
# Forward pass: JAX glue (embedding lookups, self-loops, adjacency / batched
# edge scatter precompute) + ONE fused Pallas kernel pipelined over layers.
# ---------------------------------------------------------------------------
def discrete_gnn_forward(x, edge_index, edge_attr, params, num_layer,
                         JK="last", mxu_dtype=jnp.bfloat16):
    N = x.shape[0]
    D = params["xe1"].shape[1]
    H = 2 * D
    # node axis padded to a multiple of 128: lane-dense A@h contraction AND
    # bf16 (16,128) sublane tile alignment in one shot
    N_pad = _round_up(N, 128)
    D_pad = _round_up(D, 128)
    H_pad = _round_up(H, 128)

    # node embedding lookup
    h0 = params["xe1"][x[:, 0]] + params["xe2"][x[:, 1]]                 # [N, D]

    # add self loops (attr = [4, 0]), as in GINConv.forward
    loop = jnp.arange(N, dtype=edge_index.dtype)
    ei = jnp.concatenate([edge_index, jnp.stack([loop, loop])], axis=1)
    sl_attr = jnp.concatenate(
        [jnp.full((N, 1), 4, edge_attr.dtype), jnp.zeros((N, 1), edge_attr.dtype)],
        axis=1)
    ea = jnp.concatenate([edge_attr, sl_attr], axis=0)
    src, tgt = ei[0], ei[1]

    # dense adjacency with multiplicity (self-loops included): A[t, s] += 1
    A = jnp.zeros((N, N), jnp.float32).at[tgt, src].add(1.0)
    if mxu_dtype == jnp.bfloat16:
        try:
            # integer multiplicities are exact in bf16 only up to 256
            assert float(jnp.max(A)) <= 256.0, \
                "edge multiplicity exceeds bf16-exact integer range"
        except jax.errors.ConcretizationTypeError:
            pass  # traced inputs; skip the runtime check

    # ONE batched edge-embedding gather + segment_sum across all layers
    ee1 = jnp.stack([p["ee1"] for p in params["layers"]])                # [L, 6, D]
    ee2 = jnp.stack([p["ee2"] for p in params["layers"]])                # [L, 3, D]
    eemb_all = ee1[:, ea[:, 0], :] + ee2[:, ea[:, 1], :]                 # [L, E_tot, D]
    eagg_all = jax.vmap(
        lambda e: jax.ops.segment_sum(e, tgt, num_segments=N))(eemb_all)  # [L, N, D]
    eagg = jnp.pad(eagg_all,
                   ((0, 0), (0, N_pad - N), (0, D_pad - D))).astype(mxu_dtype)

    w1 = jnp.pad(jnp.stack([p["w1"] for p in params["layers"]]),
                 ((0, 0), (0, D_pad - D), (0, H_pad - H))).astype(mxu_dtype)
    w2 = jnp.pad(jnp.stack([p["w2"] for p in params["layers"]]),
                 ((0, 0), (0, H_pad - H), (0, D_pad - D))).astype(mxu_dtype)
    small = jnp.stack([
        jnp.stack([_pad1(p["b1"], H_pad), _pad1(p["b2"], H_pad),
                   _pad1(p["gamma"], H_pad), _pad1(p["beta"], H_pad)], axis=0)
        for p in params["layers"]])                                      # [L, 4, H_pad]
    small = jnp.pad(small, ((0, 0), (0, 4), (0, 0)))                     # [L, 8, H_pad]

    h0_pad = _pad2(h0, N_pad, D_pad)
    A_pad = _pad2(A, N_pad, N_pad).astype(mxu_dtype)

    jk_last = (JK == "last")
    hs = _fused_gin_pallas(h0_pad, A_pad, eagg, w1, w2, small,
                           num_layer=num_layer, n_valid=N, jk_last=jk_last,
                           mxu_dtype=mxu_dtype)

    if jk_last:
        return hs[:N, :D]
    h_list = [h0] + [hs[l, :N, :D] for l in range(num_layer)]
    if JK == "concat":
        return jnp.concatenate(h_list, axis=1)
    elif JK == "max":
        return jnp.max(jnp.stack(h_list, axis=0), axis=0)
    elif JK == "sum":
        return jnp.sum(jnp.stack(h_list, axis=0), axis=0)
    raise ValueError(JK)


# ---------------------------------------------------------------------------
# Pure-JAX reference (mirrors the torch forward), for verification
# ---------------------------------------------------------------------------
def discrete_gnn_reference(x, edge_index, edge_attr, params, num_layer, JK="last"):
    N = x.shape[0]
    h = params["xe1"][x[:, 0]] + params["xe2"][x[:, 1]]
    loop = jnp.arange(N, dtype=edge_index.dtype)
    ei = jnp.concatenate([edge_index, jnp.stack([loop, loop])], axis=1)
    sl_attr = jnp.concatenate(
        [jnp.full((N, 1), 4, edge_attr.dtype), jnp.zeros((N, 1), edge_attr.dtype)],
        axis=1)
    ea = jnp.concatenate([edge_attr, sl_attr], axis=0)
    src, tgt = ei[0], ei[1]
    h_list = [h]
    for l in range(num_layer):
        p = params["layers"][l]
        eemb = p["ee1"][ea[:, 0]] + p["ee2"][ea[:, 1]]
        msgs = h_list[l][src] + eemb
        aggr = jax.ops.segment_sum(msgs, tgt, num_segments=N)
        z1 = jnp.maximum(aggr @ p["w1"] + p["b1"], 0.0)
        z2 = z1 @ p["w2"] + p["b2"]
        mean = jnp.mean(z2, axis=0, keepdims=True)
        var = jnp.mean((z2 - mean) ** 2, axis=0, keepdims=True)
        hb = (z2 - mean) / jnp.sqrt(var + BN_EPS) * p["gamma"] + p["beta"]
        if l != num_layer - 1:
            hb = jnp.maximum(hb, 0.0)
        h_list.append(hb)
    if JK == "last":
        return h_list[-1]
    elif JK == "concat":
        return jnp.concatenate(h_list, axis=1)
    elif JK == "max":
        return jnp.max(jnp.stack(h_list, axis=0), axis=0)
    elif JK == "sum":
        return jnp.sum(jnp.stack(h_list, axis=0), axis=0)
    raise ValueError(JK)


if __name__ == "__main__":
    NUM_LAYER = 3
    EMB_DIM = 32
    N_NODES = 16
    N_EDGES = 24

    key = jax.random.PRNGKey(0)
    k_param, k0, k1, k2, k3, k4, k5 = jax.random.split(key, 7)

    params = make_params(k_param, NUM_LAYER, EMB_DIM)

    x = jnp.stack([jax.random.randint(k0, (N_NODES,), 0, NUM_ATOM_TYPE),
                   jax.random.randint(k1, (N_NODES,), 0, NUM_CHIRALITY_TAG)],
                  axis=1).astype(jnp.int32)                       # [16, 2]
    edge_index = jnp.stack([jax.random.randint(k2, (N_EDGES,), 0, N_NODES),
                            jax.random.randint(k3, (N_EDGES,), 0, N_NODES)]
                           ).astype(jnp.int32)                    # [2, 24]
    edge_attr = jnp.stack([jax.random.randint(k4, (N_EDGES,), 0, NUM_BOND_TYPE),
                           jax.random.randint(k5, (N_EDGES,), 0, NUM_BOND_DIRECTION)],
                          axis=1).astype(jnp.int32)               # [24, 2]

    ref = discrete_gnn_reference(x, edge_index, edge_attr, params,
                                 num_layer=NUM_LAYER, JK="last")

    # main (deployed) path: bf16 MXU operands, f32 accumulation / VPU math
    out = discrete_gnn_forward(x, edge_index, edge_attr, params,
                               num_layer=NUM_LAYER, JK="last",
                               mxu_dtype=jnp.bfloat16)
    out = jax.block_until_ready(out)
    assert out.shape == (N_NODES, EMB_DIM)
    assert bool(jnp.all(jnp.isfinite(out)))
    # bf16 path tolerance-checked too (BN renormalizes, so errors stay small)
    err_bf16 = float(jnp.max(jnp.abs(out - ref)))
    assert err_bf16 < 0.5, f"bf16 kernel/reference mismatch: {err_bf16}"

    # exact-path correctness check (f32 MXU) vs pure-JAX reference, JK="last"
    out_f32 = discrete_gnn_forward(x, edge_index, edge_attr, params,
                                   num_layer=NUM_LAYER, JK="last",
                                   mxu_dtype=jnp.float32)
    err_f32 = float(jnp.max(jnp.abs(out_f32 - ref)))
    assert err_f32 < 3e-3, f"f32 kernel/reference mismatch: {err_f32}"

    # exercise the per-layer-output (non-"last" JK) code path
    out_sum = discrete_gnn_forward(x, edge_index, edge_attr, params,
                                   num_layer=NUM_LAYER, JK="sum",
                                   mxu_dtype=jnp.float32)
    ref_sum = discrete_gnn_reference(x, edge_index, edge_attr, params,
                                     num_layer=NUM_LAYER, JK="sum")
    err_sum = float(jnp.max(jnp.abs(out_sum - ref_sum)))
    assert err_sum < 5e-3, f"JK=sum kernel/reference mismatch: {err_sum}"

    print("KERNEL_OK")
</pallas_src>

<mosaic_0001>
module attributes {stable_mosaic.version = 11 : i64} {
  func.func @_gin_layer_kernel(%arg0: i32, %arg1: memref<128x128xf32, #tpu.memory_space<vmem>>, %arg2: memref<128x128xbf16, #tpu.memory_space<vmem>>, %arg3: memref<1x128x128xbf16, #tpu.memory_space<vmem>>, %arg4: memref<1x128x128xbf16, #tpu.memory_space<vmem>>, %arg5: memref<1x128x128xbf16, #tpu.memory_space<vmem>>, %arg6: memref<1x8x128xf32, #tpu.memory_space<vmem>>, %arg7: memref<128x128xf32, #tpu.memory_space<vmem>>, %arg8: memref<128x128xf32, #tpu.memory_space<vmem>>) attributes {dimension_semantics = [#tpu.dimension_semantics<arbitrary>], iteration_bounds = array<i64: 3>, scalar_prefetch = 0 : i64, scratch_operands = 1 : i64, tpu.core_type = #tpu.core_type<tc>, window_params = [{pipeline_mode = #tpu.pipeline_mode<synchronous>, transform_indices = @transform_0, window_bounds = array<i64: 128, 128>}, {pipeline_mode = #tpu.pipeline_mode<synchronous>, transform_indices = @transform_1, window_bounds = array<i64: 128, 128>}, {transform_indices = @transform_2, window_bounds = array<i64: 1, 128, 128>}, {transform_indices = @transform_3, window_bounds = array<i64: 1, 128, 128>}, {transform_indices = @transform_4, window_bounds = array<i64: 1, 128, 128>}, {transform_indices = @transform_5, window_bounds = array<i64: 1, 8, 128>}, {pipeline_mode = #tpu.pipeline_mode<synchronous>, transform_indices = @transform_6, window_bounds = array<i64: 128, 128>}]} {
    %c0_i32 = arith.constant 0 : i32
    %0 = arith.cmpi eq, %arg0, %c0_i32 : i32
    %1 = arith.extui %0 : i1 to i32
    %c0_i32_0 = arith.constant 0 : i32
    %2 = arith.cmpi ne, %1, %c0_i32_0 : i32
    scf.if %2 {
      %c0_29 = arith.constant 0 : index
      %c0_30 = arith.constant 0 : index
      %68 = vector.load %arg1[%c0_29, %c0_30] : memref<128x128xf32, #tpu.memory_space<vmem>>, vector<128x128xf32>
      %c0_31 = arith.constant 0 : index
      %c0_32 = arith.constant 0 : index
      %69 = vector.load %arg8[%c0_31, %c0_32] : memref<128x128xf32, #tpu.memory_space<vmem>>, vector<128x128xf32>
      tpu.vector_store %arg8[%c0_31, %c0_32], %68 {strides = array<i32>} : memref<128x128xf32, #tpu.memory_space<vmem>>, vector<128x128xf32>,
    } else {
    }
    %3 = tpu.iota {dimensions = array<i32: 0>} : vector<128x1xi32>
    %c16_i32 = arith.constant 16 : i32
    %4 = vector.broadcast %c16_i32 : i32 to vector<128x1xi32>
    %5 = arith.cmpi slt, %3, %4 : vector<128x1xi32>
    %6 = arith.extui %5 : vector<128x1xi1> to vector<128x1xi32>
    %7 = arith.sitofp %6 : vector<128x1xi32> to vector<128x1xf32>
    %c0 = arith.constant 0 : index
    %c0_1 = arith.constant 0 : index
    %8 = vector.load %arg8[%c0, %c0_1] : memref<128x128xf32, #tpu.memory_space<vmem>>, vector<128x128xf32>
    %c0_2 = arith.constant 0 : index
    %c0_3 = arith.constant 0 : index
    %9 = vector.load %arg2[%c0_2, %c0_3] : memref<128x128xbf16, #tpu.memory_space<vmem>>, vector<128x128xbf16>
    %10 = arith.truncf %8 : vector<128x128xf32> to vector<128x128xbf16>
    %cst = arith.constant dense<0.000000e+00> : vector<128x128xf32>
    %11 = tpu.matmul %9, %10, %cst {dimension_numbers = #tpu.dot_dimension_numbers<[1], [0], [0], [1], [0, 0, 1, 1], [], []>} : vector<128x128xbf16>, vector<128x128xbf16>, vector<128x128xf32> -> vector<128x128xf32>
    %c0_4 = arith.constant 0 : index
    %c0_5 = arith.constant 0 : index
    %c0_6 = arith.constant 0 : index
    %12 = vector.load %arg3[%c0_4, %c0_5, %c0_6] : memref<1x128x128xbf16, #tpu.memory_space<vmem>>, vector<1x128x128xbf16>
    %13 = vector.shape_cast %12 : vector<1x128x128xbf16> to vector<128x128xbf16>
    %14 = arith.extf %13 : vector<128x128xbf16> to vector<128x128xf32>
    %15 = arith.addf %11, %14 : vector<128x128xf32>
    %c0_7 = arith.constant 0 : index
    %c0_8 = arith.constant 0 : index
    %c0_9 = arith.constant 0 : index
    %16 = vector.load %arg6[%c0_7, %c0_8, %c0_9] : memref<1x8x128xf32, #tpu.memory_space<vmem>>, vector<1x8x128xf32>
    %17 = vector.shape_cast %16 : vector<1x8x128xf32> to vector<8x128xf32>
    %18 = arith.truncf %15 : vector<128x128xf32> to vector<128x128xbf16>
    %c0_10 = arith.constant 0 : index
    %c0_11 = arith.constant 0 : index
    %c0_12 = arith.constant 0 : index
    %19 = vector.load %arg4[%c0_10, %c0_11, %c0_12] : memref<1x128x128xbf16, #tpu.memory_space<vmem>>, vector<1x128x128xbf16>
    %20 = vector.shape_cast %19 : vector<1x128x128xbf16> to vector<128x128xbf16>
    %cst_13 = arith.constant dense<0.000000e+00> : vector<128x128xf32>
    %21 = tpu.matmul %18, %20, %cst_13 {dimension_numbers = #tpu.dot_dimension_numbers<[1], [0], [0], [1], [0, 0, 1, 1], [], []>} : vector<128x128xbf16>, vector<128x128xbf16>, vector<128x128xf32> -> vector<128x128xf32>
    %22 = vector.extract_strided_slice %17 {offsets = [0, 0], sizes = [1, 128], strides = [1, 1]} : vector<8x128xf32> to vector<1x128xf32>
    %23 = vector.broadcast %22 : vector<1x128xf32> to vector<128x128xf32>
    %24 = arith.addf %21, %23 : vector<128x128xf32>
    %cst_14 = arith.constant 0.000000e+00 : f32
    %25 = vector.broadcast %cst_14 : f32 to vector<128x128xf32>
    %26 = arith.maximumf %24, %25 : vector<128x128xf32>
    %27 = arith.truncf %26 : vector<128x128xf32> to vector<128x128xbf16>
    %c0_15 = arith.constant 0 : index
    %c0_16 = arith.constant 0 : index
    %c0_17 = arith.constant 0 : index
    %28 = vector.load %arg5[%c0_15, %c0_16, %c0_17] : memref<1x128x128xbf16, #tpu.memory_space<vmem>>, vector<1x128x128xbf16>
    %29 = vector.shape_cast %28 : vector<1x128x128xbf16> to vector<128x128xbf16>
    %cst_18 = arith.constant dense<0.000000e+00> : vector<128x128xf32>
    %30 = tpu.matmul %27, %29, %cst_18 {dimension_numbers = #tpu.dot_dimension_numbers<[1], [0], [0], [1], [0, 0, 1, 1], [], []>} : vector<128x128xbf16>, vector<128x128xbf16>, vector<128x128xf32> -> vector<128x128xf32>
    %31 = vector.extract_strided_slice %17 {offsets = [1, 0], sizes = [1, 128], strides = [1, 1]} : vector<8x128xf32> to vector<1x128xf32>
    %32 = vector.broadcast %31 : vector<1x128xf32> to vector<128x128xf32>
    %33 = arith.addf %30, %32 : vector<128x128xf32>
    %34 = vector.broadcast %7 : vector<128x1xf32> to vector<128x128xf32>
    %35 = arith.mulf %33, %34 : vector<128x128xf32>
    %cst_19 = arith.constant dense<0.000000e+00> : vector<128xf32>
    %36 = vector.multi_reduction <add>, %35, %cst_19 [0] : vector<128x128xf32> to vector<128xf32>
    %37 = vector.shape_cast %36 : vector<128xf32> to vector<1x128xf32>
    %cst_20 = arith.constant 6.250000e-02 : f32
    %38 = vector.broadcast %cst_20 : f32 to vector<1x128xf32>
    %39 = arith.mulf %37, %38 : vector<1x128xf32>
    %40 = vector.broadcast %39 : vector<1x128xf32> to vector<128x128xf32>
    %41 = arith.subf %33, %40 : vector<128x128xf32>
    %42 = vector.broadcast %7 : vector<128x1xf32> to vector<128x128xf32>
    %43 = arith.mulf %41, %42 : vector<128x128xf32>
    %44 = arith.mulf %43, %43 : vector<128x128xf32>
    %cst_21 = arith.constant dense<0.000000e+00> : vector<128xf32>
    %45 = vector.multi_reduction <add>, %44, %cst_21 [0] : vector<128x128xf32> to vector<128xf32>
    %46 = vector.shape_cast %45 : vector<128xf32> to vector<1x128xf32>
    %cst_22 = arith.constant 6.250000e-02 : f32
    %47 = vector.broadcast %cst_22 : f32 to vector<1x128xf32>
    %48 = arith.mulf %46, %47 : vector<1x128xf32>
    %49 = vector.broadcast %39 : vector<1x128xf32> to vector<128x128xf32>
    %50 = arith.subf %33, %49 : vector<128x128xf32>
    %cst_23 = arith.constant 9.99999974E-6 : f32
    %51 = vector.broadcast %cst_23 : f32 to vector<1x128xf32>
    %52 = arith.addf %48, %51 : vector<1x128xf32>
    %53 = math.rsqrt %52 : vector<1x128xf32>
    %54 = vector.broadcast %53 : vector<1x128xf32> to vector<128x128xf32>
    %55 = arith.mulf %50, %54 : vector<128x128xf32>
    %56 = vector.extract_strided_slice %17 {offsets = [2, 0], sizes = [1, 128], strides = [1, 1]} : vector<8x128xf32> to vector<1x128xf32>
    %57 = vector.broadcast %56 : vector<1x128xf32> to vector<128x128xf32>
    %58 = arith.mulf %55, %57 : vector<128x128xf32>
    %59 = vector.extract_strided_slice %17 {offsets = [3, 0], sizes = [1, 128], strides = [1, 1]} : vector<8x128xf32> to vector<1x128xf32>
    %60 = vector.broadcast %59 : vector<1x128xf32> to vector<128x128xf32>
    %61 = arith.addf %58, %60 : vector<128x128xf32>
    %c2_i32 = arith.constant 2 : i32
    %62 = arith.cmpi eq, %arg0, %c2_i32 : i32
    %cst_24 = arith.constant 0.000000e+00 : f32
    %63 = vector.broadcast %cst_24 : f32 to vector<128x128xf32>
    %64 = arith.maximumf %61, %63 : vector<128x128xf32>
    %65 = arith.select %62, %61, %64 : vector<128x128xf32>
    %c0_25 = arith.constant 0 : index
    %c0_26 = arith.constant 0 : index
    %66 = vector.load %arg8[%c0_25, %c0_26] : memref<128x128xf32, #tpu.memory_space<vmem>>, vector<128x128xf32>
    tpu.vector_store %arg8[%c0_25, %c0_26], %65 {strides = array<i32>} : memref<128x128xf32, #tpu.memory_space<vmem>>, vector<128x128xf32>,
    %c0_27 = arith.constant 0 : index
    %c0_28 = arith.constant 0 : index
    %67 = vector.load %arg7[%c0_27, %c0_28] : memref<128x128xf32, #tpu.memory_space<vmem>>, vector<128x128xf32>
    tpu.vector_store %arg7[%c0_27, %c0_28], %65 {strides = array<i32>} : memref<128x128xf32, #tpu.memory_space<vmem>>, vector<128x128xf32>,
    return
  }
  func.func @transform_0(%arg0: i32) -> (i32, i32) {
    %c0_i32 = arith.constant 0 : i32
    %c0_i32_0 = arith.constant 0 : i32
    %c0_i32_1 = arith.constant 0 : i32
    return %c0_i32, %c0_i32_0 : i32, i32
  }
  func.func @transform_1(%arg0: i32) -> (i32, i32) {
    %c0_i32 = arith.constant 0 : i32
    %c0_i32_0 = arith.constant 0 : i32
    %c0_i32_1 = arith.constant 0 : i32
    return %c0_i32, %c0_i32_0 : i32, i32
  }
  func.func @transform_2(%arg0: i32) -> (i32, i32, i32) {
    %c0_i32 = arith.constant 0 : i32
    %c0_i32_0 = arith.constant 0 : i32
    %c0_i32_1 = arith.constant 0 : i32
    return %arg0, %c0_i32, %c0_i32_0 : i32, i32, i32
  }
  func.func @transform_3(%arg0: i32) -> (i32, i32, i32) {
    %c0_i32 = arith.constant 0 : i32
    %c0_i32_0 = arith.constant 0 : i32
    %c0_i32_1 = arith.constant 0 : i32
    return %arg0, %c0_i32, %c0_i32_0 : i32, i32, i32
  }
  func.func @transform_4(%arg0: i32) -> (i32, i32, i32) {
    %c0_i32 = arith.constant 0 : i32
    %c0_i32_0 = arith.constant 0 : i32
    %c0_i32_1 = arith.constant 0 : i32
    return %arg0, %c0_i32, %c0_i32_0 : i32, i32, i32
  }
  func.func @transform_5(%arg0: i32) -> (i32, i32, i32) {
    %c0_i32 = arith.constant 0 : i32
    %c0_i32_0 = arith.constant 0 : i32
    %c0_i32_1 = arith.constant 0 : i32
    return %arg0, %c0_i32, %c0_i32_0 : i32, i32, i32
  }
  func.func @transform_6(%arg0: i32) -> (i32, i32) {
    %c0_i32 = arith.constant 0 : i32
    %c0_i32_0 = arith.constant 0 : i32
    %c0_i32_1 = arith.constant 0 : i32
    return %c0_i32, %c0_i32_0 : i32, i32
  }
}

</mosaic_0001>

<bundles_post_ra>
// kernel: tpu_custom_call.1
= control target key start
LH: loop header
LB: loop body
LE: loop exit
PB: predicated region body
PF: predicated region fallthrough
CT: control target
= control target key end

     0   :  { %s2280_s0 = inlined_call_operand.hbm [shape: f32[128,128], index: 0, kind: input, shape index: {}]   ;;  %s2281_s1 = inlined_call_operand.hbm [shape: bf16[128,128], index: 1, kind: input, shape index: {}]   ;;  %s2282_s2 = inlined_call_operand.hbm [shape: bf16[3,128,128], index: 2, kind: input, shape index: {}]   ;;  %s2283_s3 = inlined_call_operand.hbm [shape: bf16[3,128,128], index: 3, kind: input, shape index: {}]   ;;  %s2284_s4 = inlined_call_operand.hbm [shape: bf16[3,128,128], index: 4, kind: input, shape index: {}]   ;;  %s2285_s5 = inlined_call_operand.hbm [shape: f32[3,8,128], index: 5, kind: input, shape index: {}]   ;;  %s2286_s6 = inlined_call_operand.hbm [shape: f32[128,128], index: 6, kind: output, shape index: {}]  }
   0x1   :  { %2288 = sst [smem:[#allocation18_spill]] %s2280_s0 }
   0x2   :  { %2289 = sst [smem:[#allocation19_spill]] %s2282_s2 }
   0x3   :  { %11 = vsyncpa [#allocation4], 0 }
   0x4   :  { %12 = vsyncpa [#allocation7], 0 }
   0x5   :  { %13 = vsyncpa [#allocation5], 0  ;;  %s1917_s21 = smov 0   ;;  %s1919_s22 = smov 0  }
   0x6   :  { %s1921_s23 = smov 0   ;;  %s1923_s24 = smov 0  }
   0x7 LB: > { %s1936_s25 = sadd.s32 4294967295, %s1871_s24   ;;  %p81_p0 = scmp.ne.s32.totalorder %s1863_s22, %s1859_s21  ;;  %s1871_s24 = sphi %s1923_s24, %s2304_s24   ;;  %s1867_s23 = sphi %s1921_s23, %s2303_s23   ;;  %s1863_s22 = sphi %s1919_s22, %s2302_s22   ;;  %s1859_s21 = sphi %s1917_s21, %s2301_s21  }
   0x8   : > { %p82_p1 = scmp.eq.s32.totalorder %s1936_s25, 0  ;;  %p1314_p2 = scmp.ge.s32.totalorder %s1871_s24, 1 }
   0x9   : > { %p191_p3 = scmp.lt.s32.totalorder %s1871_s24, 4  ;;  %p1315_p4 = scmp.ne.s32.totalorder %s1936_s25, 0 }
   0xa   : > { %p1945_p5 = por %p82_p1, %p81_p0  ;;  %s2291_s0 = sld [smem:[#allocation18_spill]] }
   0xb   : > { %p1952_p6 = pnand %p1314_p2, %p191_p3  ;;  %s1873_s7 = smov [#allocation3]  }
   0xc   : > { %s204_s8 = sshll.u32 %s1873_s7, 4  ;;  %s1965_s10 = sadd.s32 1, %s1871_s24   ;;  %s205_s8 = int_to_ptr.vmem [resolvable:$true] %s204_s8 }
   0xd   : > { %p1547_p7 = pneg %p1952_p6  ;;  %s1874_s11 = smov 128  }
   0xe   : > { %s1875_s12 = smov 8   ;;  %s65_s13 = ssub.s32 %s1871_s24, %s1965_s10 }
   0xf   : > { %p1960_p8 = pnand %p1547_p7, %p82_p1  ;;  %s68_s14 = sadd.s32 1, %s1867_s23 }
  0x10   : > { %s202_s29 = sshll.u32 %s2291_s0, 4  ;;  %p66_p9 = scmp.eq.s32.totalorder %s65_s13, 0  ;;  %s203_s29 = int_to_ptr.hbm [resolvable:$true] %s202_s29 }
  0x11   : > { %1550 = dma.hbm_to_vmem [thread:$0]  (!%p1960_p8), %s203_s29, 2048, %s205_s8, [#allocation4], %s1874_s11, %s1874_s11, %s1875_s12  }
  0x12   : > { %p75_p10 = scmp.ne.s32.totalorder %s1867_s23, %s1863_s22  ;;  %p76_p11 = scmp.eq.s32.totalorder %s1871_s24, 0 }
  0x13   : > { %s1976_s15 = scalar_select %p66_p9, %s1867_s23, %s68_s14  }
  0x14   : > { %p77_p12 = por %p76_p11, %p75_p10  ;;  %p1569_p13 = scmp.lt.s32.totalorder %s1871_s24, 3 }
  0x15   : > { %2294 = sst [smem:[#allocation17_spill]] %s1976_s15  ;;  %s232_s16 = sand.u32 1, %s1871_s24  }
  0x16   : > { %s2287_s17 = sand.u32 1, %s1867_s23   ;;  %s1986_s19 = sshll.u32 %s1871_s24, 6 }
  0x17   : > { %s1983_s18 = sshll.u32 %s2287_s17, 6  ;;  %s2295_s2 = sld [smem:[#allocation19_spill]] }
  0x18   : > { %s236_s29 = scalar_lea.vmem [#allocation8], %s1983_s18  ;;  %p1999_p0 = pnand %p1569_p13, %p77_p12 }
  0x19   : > { %s1995_s7 = sshll.u32 %s236_s29, 4  ;;  %s263_s13 = scalar_lea.hbm %s2283_s3, %s1986_s19  ;;  %s245_s7 = int_to_ptr.vmem [resolvable:$true] %s1995_s7 }
  0x1a   : > { %s258_s14 = scalar_lea.vmem [#allocation9], %s1983_s18  ;;  %s2010_s21 = sshll.u32 %s263_s13, 4  ;;  %s265_s21 = int_to_ptr.hbm [resolvable:$true] %s2010_s21 }
  0x1b   : > { %s2008_s20 = sshll.u32 %s258_s14, 4  ;;  %p1651_p3 = pneg %p1999_p0  ;;  %s267_s20 = int_to_ptr.vmem [resolvable:$true] %s2008_s20 }
  0x1d   : > { %s241_s27 = scalar_lea.hbm %s2295_s2, %s1986_s19  ;;  %s1654_s0 = scalar_lea.hbm %s2295_s2, 192 }
  0x1e   : > { %s1992_s28 = sshll.u32 %s241_s27, 4  ;;  %s2012_s27 = scalar_lea.sflag [#allocation4], %s232_s16  ;;  %s243_s28 = int_to_ptr.hbm [resolvable:$true] %s1992_s28 }
  0x1f   : > { %s1647_s29 = sshra.s32 %s243_s28, 4  ;;  %s1648_s29 = int_to_ptr.hbm [resolvable:$true] %s1647_s29 }
  0x20   : > { %s1649_s17 = scalar_lea.hbm %s1648_s29, 64  ;;  %p1655_p10 = scmp.lt.s32.totalorder %s1648_s29, %s2295_s2 }
  0x21   : > { %p1650_p2 = scmp.ne.s32.totalorder %s1648_s29, %s1649_s17  ;;  %p1656_p11 = scmp.lt.s32.totalorder %s1654_s0, %s1649_s17 }
  0x23   : > { %p1652_p7 = pnand %p1651_p3, %p1650_p2  ;;  %p1657_p12 = por %p1656_p11, %p1655_p10 }
  0x25   : > { %p1653_p9 = pneg %p1652_p7 }
  0x27   : > { %p1658_p13 = pnand %p1657_p12, %p1653_p9 }
  0x29   : > { %1661 = shalt.err (!%p1658_p13)
}
  0x2a   : > { %s1876_s16 = smov 64   ;;  %s1877_s13 = smov 4  }
  0x2b   : > { %1557 = dma.hbm_to_vmem [thread:$0]  (!%p1999_p0), %s243_s28, 1024, %s245_s7, %s2012_s27, %s1876_s16, %s1876_s16, %s1877_s13  }
  0x2c   : > { %s1677_s15 = sshra.s32 %s265_s21, 4  ;;  %s1684_s11 = scalar_lea.hbm %s2283_s3, 192  ;;  %s1678_s15 = int_to_ptr.hbm [resolvable:$true] %s1677_s15 }
  0x2d   : > { %s1679_s0 = scalar_lea.hbm %s1678_s15, 64  ;;  %p1685_p10 = scmp.lt.s32.totalorder %s1678_s15, %s2283_s3 }
  0x2e   : > { %p1680_p2 = scmp.ne.s32.totalorder %s1678_s15, %s1679_s0  ;;  %p1686_p11 = scmp.lt.s32.totalorder %s1684_s11, %s1679_s0 }
  0x30   : > { %p1682_p7 = pnand %p1680_p2, %p1651_p3  ;;  %p1687_p12 = por %p1686_p11, %p1685_p10 }
  0x32   : > { %p1683_p9 = pneg %p1682_p7 }
  0x34   : > { %p1688_p13 = pnand %p1687_p12, %p1683_p9 }
  0x36   : > { %1691 = shalt.err (!%p1688_p13)
}
  0x37   : > { %1560 = dma.hbm_to_vmem [thread:$0]  (!%p1999_p0), %s265_s21, 1024, %s267_s20, %s2012_s27, %s1876_s16, %s1876_s16, %s1877_s13  }
  0x38   : > { %s285_s17 = scalar_lea.hbm %s2284_s4, %s1986_s19  ;;  %s280_s15 = scalar_lea.vmem [#allocation10], %s1983_s18 }
  0x39   : > { %s286_s29 = sshll.u32 %s285_s17, 4  ;;  %s288_s0 = sshll.u32 %s280_s15, 4  ;;  %s287_s29 = int_to_ptr.hbm [resolvable:$true] %s286_s29  ;;  %s289_s0 = int_to_ptr.vmem [resolvable:$true] %s288_s0 }
  0x3a   : > { %s1707_s11 = sshra.s32 %s287_s29, 4  ;;  %s1714_s20 = scalar_lea.hbm %s2284_s4, 192  ;;  %s1708_s11 = int_to_ptr.hbm [resolvable:$true] %s1707_s11 }
  0x3b   : > { %s1709_s12 = scalar_lea.hbm %s1708_s11, 64  ;;  %p1715_p10 = scmp.lt.s32.totalorder %s1708_s11, %s2284_s4 }
  0x3c   : > { %p1710_p2 = scmp.ne.s32.totalorder %s1708_s11, %s1709_s12  ;;  %p1716_p11 = scmp.lt.s32.totalorder %s1714_s20, %s1709_s12 }
  0x3e   : > { %p1712_p7 = pnand %p1710_p2, %p1651_p3  ;;  %p1717_p12 = por %p1716_p11, %p1715_p10 }
  0x40   : > { %p1713_p9 = pneg %p1712_p7 }
  0x42   : > { %p1718_p13 = pnand %p1717_p12, %p1713_p9 }
  0x44   : > { %1721 = shalt.err (!%p1718_p13)
}
  0x45   : > { %1563 = dma.hbm_to_vmem [thread:$0]  (!%p1999_p0), %s287_s29, 1024, %s289_s0, %s2012_s27, %s1876_s16, %s1876_s16, %s1877_s13  }
  0x46   : > { %s216_s19 = sshll.u32 %s2281_s1, 4  ;;  %s1878_s7 = smov [#allocation6]   ;;  %s217_s19 = int_to_ptr.hbm [resolvable:$true] %s216_s19 }
  0x47   : > { %s218_s17 = sshll.u32 %s1878_s7, 4  ;;  %s2297_s15 = sand.u32 1, %s1867_s23   ;;  %s219_s17 = int_to_ptr.vmem [resolvable:$true] %s218_s17 }
  0x48   : > { %s1327_s11 = sshll.u32 %s2297_s15, 3  ;;  %s1328_s12 = sshll.u32 %s1871_s24, 3 }
  0x49   : > { %1553 = dma.hbm_to_vmem [thread:$0]  (!%p1960_p8), %s217_s19, 1024, %s219_s17, [#allocation7], %s1876_s16, %s1876_s16, %s1877_s13  }
  0x4a   : > { %s306_s29 = scalar_lea.hbm %s2285_s5, %s1328_s12  ;;  %s302_s0 = scalar_lea.vmem [#allocation11], %s1327_s11 }
  0x4b   : > { %s310_s21 = sshll.u32 %s302_s0, 4  ;;  %s308_s28 = sshll.u32 %s306_s29, 4  ;;  %s311_s21 = int_to_ptr.vmem [resolvable:$true] %s310_s21  ;;  %s309_s28 = int_to_ptr.hbm [resolvable:$true] %s308_s28 }
  0x4c   : > { %s1767_s2 = sshra.s32 %s309_s28, 4  ;;  %s1774_s24 = scalar_lea.hbm %s2285_s5, 24  ;;  %s1768_s2 = int_to_ptr.hbm [resolvable:$true] %s1767_s2 }
  0x4d   : > { %s1769_s18 = scalar_lea.hbm %s1768_s2, 8  ;;  %p1775_p8 = scmp.lt.s32.totalorder %s1768_s2, %s2285_s5 }
  0x4e   : > { %p1770_p2 = scmp.ne.s32.totalorder %s1768_s2, %s1769_s18  ;;  %p1776_p10 = scmp.lt.s32.totalorder %s1774_s24, %s1769_s18 }
  0x50   : > { %p1772_p7 = pnand %p1770_p2, %p1651_p3  ;;  %p1777_p11 = por %p1776_p10, %p1775_p8 }
  0x52   : > { %p1773_p9 = pneg %p1772_p7 }
  0x54   : > { %p1778_p12 = pnand %p1777_p11, %p1773_p9 }
  0x56   : > { %1781 = shalt.err (!%p1778_p12)
}
  0x57   : > { %1566 = dma.hbm_to_vmem [thread:$0]  (!%p1999_p0), %s309_s28, 128, %s311_s21, %s2012_s27  }
  0x58   : > { %319 = sbr.rel (%p1952_p6) target bundleno = 807 (0x327), region = 44 }
  0x5d   : > { %1842 = dma.done.wait (%p82_p1), [#allocation4], 2048  }
  0x5e   : > { %1844 = vsyncadd (%p82_p1), [#allocation4], 4294965248 }
  0x5f   : > { %1846 = dma.done.wait (%p82_p1), [#allocation7], 1024  }
  0x60   : > { %1848 = vsyncadd (%p82_p1), [#allocation7], 4294966272  ;;  %s331_s8 = sand.u32 1, %s1936_s25   ;;  %s333_s27 = sand.u32 1, %s1863_s22  }
  0x61   : > { %s1332_s7 = sshll.u32 %s333_s27, 6  ;;  %s332_s30 = scalar_lea.sflag [#allocation4], %s331_s8 }
  0x62   : > { %s2106_s17 = scalar_lea.vmem [#allocation8], %s1332_s7 }
  0x63   : > { %1850 = dma.done.wait (%p1945_p5), %s332_s30, 3200  }
  0x64   : > { %1852 = vsyncadd (%p1945_p5), %s332_s30, 4294964096  ;;  %s2112_s15 = sshll.u32 %s333_s27, 3  ;;  %s2114_s11 = scalar_lea.vmem [#allocation9], %s1332_s7 }
  0x65   : > { %s2116_s12 = scalar_lea.vmem [#allocation10], %s1332_s7  ;;  %s365_s14 = scalar_lea.vmem [#allocation11], %s2112_s15 }
  0x66   : > { %408 = sbr.rel (%p1315_p4) target bundleno = 124 (0x7c), region = 72 }
  0x6b   : > { %v409_v0 = vld [vmem:[#allocation3] sm:$0xff]  ;;  %v410_v1 = vld [vmem:[#allocation3 + $0x8] sm:$0xff]  ;;  %v411_v2 = vld [vmem:[#allocation3 + $0x10] sm:$0xff] }
  0x6c   : > { %425 = vst [vmem:[#allocation2 + $0x30] sm:$0xff] %v409_v0  ;;  %v412_v3 = vld [vmem:[#allocation3 + $0x18] sm:$0xff]  ;;  %v413_v4 = vld [vmem:[#allocation3 + $0x20] sm:$0xff]  ;;  %v414_v5 = vld [vmem:[#allocation3 + $0x28] sm:$0xff] }
  0x6d   : > { %426 = vst [vmem:[#allocation2] sm:$0xff] %v410_v1  ;;  %v415_v6 = vld [vmem:[#allocation3 + $0x30] sm:$0xff]  ;;  %v416_v7 = vld [vmem:[#allocation3 + $0x38] sm:$0xff]  ;;  %v417_v8 = vld [vmem:[#allocation3 + $0x40] sm:$0xff] }
  0x6e   : > { %427 = vst [vmem:[#allocation2 + $0x58] sm:$0xff] %v411_v2  ;;  %v418_v9 = vld [vmem:[#allocation3 + $0x48] sm:$0xff]  ;;  %v419_v10 = vld [vmem:[#allocation3 + $0x50] sm:$0xff]  ;;  %v420_v11 = vld [vmem:[#allocation3 + $0x58] sm:$0xff] }
  0x6f   : > { %428 = vst [vmem:[#allocation2 + $0x18] sm:$0xff] %v412_v3  ;;  %v421_v12 = vld [vmem:[#allocation3 + $0x60] sm:$0xff]  ;;  %v422_v13 = vld [vmem:[#allocation3 + $0x68] sm:$0xff]  ;;  %v423_v14 = vld [vmem:[#allocation3 + $0x70] sm:$0xff] }
  0x70   : > { %429 = vst [vmem:[#allocation2 + $0x50] sm:$0xff] %v413_v4  ;;  %v424_v15 = vld [vmem:[#allocation3 + $0x78] sm:$0xff] }
  0x71   : > { %430 = vst [vmem:[#allocation2 + $0x68] sm:$0xff] %v414_v5 }
  0x72   : > { %431 = vst [vmem:[#allocation2 + $0x8] sm:$0xff] %v415_v6 }
  0x73   : > { %432 = vst [vmem:[#allocation2 + $0x48] sm:$0xff] %v416_v7 }
  0x74   : > { %433 = vst [vmem:[#allocation2 + $0x40] sm:$0xff] %v417_v8 }
  0x75   : > { %434 = vst [vmem:[#allocation2 + $0x20] sm:$0xff] %v418_v9 }
  0x76   : > { %435 = vst [vmem:[#allocation2 + $0x10] sm:$0xff] %v419_v10 }
  0x77   : > { %436 = vst [vmem:[#allocation2 + $0x38] sm:$0xff] %v420_v11 }
  0x78   : > { %437 = vst [vmem:[#allocation2 + $0x60] sm:$0xff] %v421_v12 }
  0x79   : > { %438 = vst [vmem:[#allocation2 + $0x70] sm:$0xff] %v422_v13 }
  0x7a   : > { %439 = vst [vmem:[#allocation2 + $0x78] sm:$0xff] %v423_v14 }
  0x7b   : > { %440 = vst [vmem:[#allocation2 + $0x28] sm:$0xff] %v424_v15 }
  0x7c PF: > { %v514_v25 = vld [vmem:[#allocation2 + $0x40] sm:$0xff]  ;;  %v512_v28 = vld [vmem:[#allocation2 + $0x8] sm:$0xff]  ;;  %v510_v31 = vld [vmem:[#allocation2 + $0x50] sm:$0xff]  ;;  %p1105_p1 = scmp.eq.s32.totalorder %s1936_s25, 2  ;;  %s1879_s20 = smov [#allocation12]  }
  0x7d   : > { %v516_v22 = vld [vmem:[#allocation2 + $0x10] sm:$0xff]  ;;  %v515_v26 = vld [vmem:[#allocation2 + $0x20] sm:$0xff]  ;;  %v513_v29 = vld [vmem:[#allocation2 + $0x48] sm:$0xff]  ;;  %s1178_s29 = sshll.u32 %s1879_s20, 4  ;;  %s1180_s28 = sshll.u32 %s2286_s6, 4  ;;  %s1179_s29 = int_to_ptr.vmem [resolvable:$true] %s1178_s29  ;;  %s1181_s28 = int_to_ptr.hbm [resolvable:$true] %s1180_s28 }
  0x7e   : > { %v517_v23 = vld [vmem:[#allocation2 + $0x38] sm:$0xff]  ;;  %v542_v27 = vpack.c.bf16 %v515_v26, %v514_v25  ;;  %v541_v30 = vpack.c.bf16 %v513_v29, %v512_v28  ;;  %v511_v32 = vld [vmem:[#allocation2 + $0x68] sm:$0xff]  ;;  %v506_v37 = vld [vmem:[#allocation2 + $0x30] sm:$0xff]  ;;  %s1122_s26 = scalar_select %p1105_p1, 1, 0 }
  0x7f   : > { %v518_v18 = vld [vmem:[#allocation2 + $0x60] sm:$0xff]  ;;  %v543_v24 = vpack.c.bf16 %v517_v23, %v516_v22  ;;  %v540_v33 = vpack.c.bf16 %v511_v32, %v510_v31  ;;  %v508_v34 = vld [vmem:[#allocation2 + $0x58] sm:$0xff]  ;;  %v1446_v41 = vld [vmem:[#allocation6 + $0x30] sm:$0xff]  ;;  %s1880_s2 = smov 128   ;;  %s1881_s18 = smov 8  }
  0x80   : > { %v519_v20 = vld [vmem:[#allocation2 + $0x70] sm:$0xff]  ;;  %v509_v35 = vld [vmem:[#allocation2 + $0x18] sm:$0xff]  ;;  %v507_v38 = vld [vmem:[#allocation2] sm:$0xff] }
  0x81   : > { %v520_v16 = vld [vmem:[#allocation2 + $0x78] sm:$0xff]  ;;  %v544_v21 = vpack.c.bf16 %v519_v20, %v518_v18  ;;  %v539_v36 = vpack.c.bf16 %v509_v35, %v508_v34  ;;  %v538_v39 = vpack.c.bf16 %v507_v38, %v506_v37  ;;  %v1440_v40 = vld [vmem:[#allocation6] sm:$0xff]  ;;  %v1441_v42 = vld [vmem:[#allocation6 + $0x8] sm:$0xff] }
  0x82   : > { %v521_v17 = vld [vmem:[#allocation2 + $0x28] sm:$0xff]  ;;  %v1447_v43 = vld [vmem:[#allocation6 + $0x38] sm:$0xff]  ;;  %v1442_v44 = vld [vmem:[#allocation6 + $0x10] sm:$0xff] }
  0x83   : > { %v545_v19 = vpack.c.bf16 %v521_v17, %v520_v16  ;;  %v1443_v45 = vld [vmem:[#allocation6 + $0x18] sm:$0xff]  ;;  %v1454_v47 = vld [vmem:[%s2114_s11 + $0x30] sm:$0xff]  ;;  %v1453_v48 = vld [vmem:[%s2114_s11 + $0x28] sm:$0xff] }
  0x84   : > { %v1455_v46 = vld [vmem:[%s2114_s11 + $0x38] sm:$0xff]  ;;  %v1452_v49 = vld [vmem:[%s2114_s11 + $0x20] sm:$0xff]  ;;  %v1445_v52 = vld [vmem:[#allocation6 + $0x28] sm:$0xff] }
  0x85   : > { %626 = vmatpush.bf16.msra.mxu0 %v545_v19  ;;  %1503 = vmatpush.bf16.msra.mxu3 %v545_v19  ;;  %v1444_v50 = vld [vmem:[#allocation6 + $0x20] sm:$0xff]  ;;  %v1451_v51 = vld [vmem:[%s2114_s11 + $0x18] sm:$0xff]  ;;  %v1450_v53 = vld [vmem:[%s2114_s11 + $0x10] sm:$0xff] }
  0x86   : > { %749 = vmatpush.bf16.msra.mxu1 %v1455_v46  ;;  %v1449_v54 = vld [vmem:[%s2114_s11 + $0x8] sm:$0xff]  ;;  %v1448_v55 = vld [vmem:[%s2114_s11] sm:$0xff]  ;;  %v1501_v0 = vld [vmem:[%s2106_s17 + $0x30] sm:$0xff]  }
  0x87   : > { %v1465_v57 = vld [vmem:[%s2106_s17] sm:$0xff]   ;;  %v1490_v2 = vunpack.c.l.bf16 %v1501_v0  ;;  %v1491_v5 = vunpack.c.h.bf16 %v1501_v0  ;;  %v1496_v7 = vld [vmem:[%s2106_s17 + $0x8] sm:$0xff]   ;;  %v1502_v16 = vld [vmem:[%s2106_s17 + $0x38] sm:$0xff]  }
  0x88   : > { %v1466_v58 = vunpack.c.l.bf16 %v1465_v57  ;;  %v1467_v59 = vunpack.c.h.bf16 %v1465_v57  ;;  %v1470_v9 = vunpack.c.l.bf16 %v1496_v7  ;;  %v1471_v10 = vunpack.c.h.bf16 %v1496_v7  ;;  %v1497_v23 = vld [vmem:[%s2106_s17 + $0x10] sm:$0xff]   ;;  %v2147_v0 = vld [vmem:[%s365_s14] sm:$0xff] }
  0x89   : > { %627 = vmatpush.bf16.msra.mxu0 %v544_v21  ;;  %1504 = vmatpush.bf16.msra.mxu3 %v544_v21  ;;  %v1494_v18 = vunpack.c.l.bf16 %v1502_v16  ;;  %v1495_v21 = vunpack.c.h.bf16 %v1502_v16  ;;  %v1474_v25 = vunpack.c.l.bf16 %v1497_v23  ;;  %v1475_v26 = vunpack.c.h.bf16 %v1497_v23 }
  0x8a   : > { %750 = vmatpush.bf16.msra.mxu1 %v1454_v47 }
  0x8d   : > { %628 = vmatpush.bf16.msra.mxu0 %v543_v24  ;;  %1505 = vmatpush.bf16.msra.mxu3 %v543_v24 }
  0x8e   : > { %751 = vmatpush.bf16.msra.mxu1 %v1453_v48 }
  0x91   : > { %629 = vmatpush.bf16.msra.mxu0 %v542_v27  ;;  %1506 = vmatpush.bf16.msra.mxu3 %v542_v27 }
  0x92   : > { %752 = vmatpush.bf16.msra.mxu1 %v1452_v49 }
  0x95   : > { %630 = vmatpush.bf16.msra.mxu0 %v541_v30  ;;  %1507 = vmatpush.bf16.msra.mxu3 %v541_v30 }
  0x96   : > { %753 = vmatpush.bf16.msra.mxu1 %v1451_v51 }
  0x99   : > { %631 = vmatpush.bf16.msra.mxu0 %v540_v33  ;;  %1508 = vmatpush.bf16.msra.mxu3 %v540_v33  ;;  %v1498_v33 = vld [vmem:[%s2106_s17 + $0x18] sm:$0xff]  }
  0x9a   : > { %754 = vmatpush.bf16.msra.mxu1 %v1450_v53  ;;  %v1478_v34 = vunpack.c.l.bf16 %v1498_v33  ;;  %v1479_v35 = vunpack.c.h.bf16 %v1498_v33 }
  0x9d   : > { %632 = vmatpush.bf16.msra.mxu0 %v539_v36  ;;  %1509 = vmatpush.bf16.msra.mxu3 %v539_v36 }
  0x9e   : > { %755 = vmatpush.bf16.msra.mxu1 %v1449_v54 }
  0xa1   : > { %633 = vmatpush.bf16.msra.mxu0 %v538_v39  ;;  %1510 = vmatpush.bf16.msra.mxu3 %v538_v39 }
  0xa2   : > { %756 = vmatpush.bf16.msra.mxu1 %v1448_v55 }
  0xa4   : > { %634 = vmatmul.bf16.vlgmr.msra.gmra.mxu0 %v1440_v40  ;;  %664 = vmatmul.bf16.vlgmr.msra.gmra.mxu3 %v1446_v41  ;;  %v1463_v40 = vld [vmem:[%s2116_s12 + $0x38] sm:$0xff]  ;;  %v1462_v41 = vld [vmem:[%s2116_s12 + $0x30] sm:$0xff] }
  0xa5   : > { %1511 = vmatpush.bf16.msrb.mxu3 %v1455_v46  ;;  %887 = vmatpush.bf16.msra.mxu2 %v1463_v40 }
  0xa9   : > { %1512 = vmatpush.bf16.msrb.mxu3 %v1454_v47  ;;  %888 = vmatpush.bf16.msra.mxu2 %v1462_v41  ;;  %v1460_v47 = vld [vmem:[%s2116_s12 + $0x20] sm:$0xff] }
  0xad   : > { %1513 = vmatpush.bf16.msrb.mxu3 %v1453_v48 }
  0xb1   : > { %1514 = vmatpush.bf16.msrb.mxu3 %v1452_v49 }
  0xb4   : > { %639 = vmatmul.bf16.gmra.mxu0 %v1441_v42  ;;  %669 = vmatmul.bf16.gmra.mxu3 %v1447_v43  ;;  %v1499_v43 = vld [vmem:[%s2106_s17 + $0x20] sm:$0xff]  }
  0xb5   : > { %1515 = vmatpush.bf16.msrb.mxu3 %v1451_v51  ;;  %v1483_v46 = vunpack.c.h.bf16 %v1499_v43 }
  0xb9   : > { %1516 = vmatpush.bf16.msrb.mxu3 %v1450_v53  ;;  %v1500_v53 = vld [vmem:[%s2106_s17 + $0x28] sm:$0xff]  }
  0xbd   : > { %1517 = vmatpush.bf16.msrb.mxu3 %v1449_v54  ;;  %v1486_v54 = vunpack.c.l.bf16 %v1500_v53 }
  0xc1   : > { %1518 = vmatpush.bf16.msrb.mxu3 %v1448_v55  ;;  %v1487_v55 = vunpack.c.h.bf16 %v1500_v53 }
  0xc4   : > { %644 = vmatmul.bf16.gmra.mxu0 %v1442_v44  ;;  %v1461_v44 = vld [vmem:[%s2116_s12 + $0x28] sm:$0xff] }
  0xc5   : > { %1519 = vmatpush.bf16.msra.mxu3 %v1463_v40  ;;  %889 = vmatpush.bf16.msra.mxu2 %v1461_v44 }
  0xc9   : > { %1520 = vmatpush.bf16.msra.mxu3 %v1462_v41  ;;  %890 = vmatpush.bf16.msra.mxu2 %v1460_v47 }
  0xcd   : > { %1521 = vmatpush.bf16.msra.mxu3 %v1461_v44 }
  0xd1   : > { %1522 = vmatpush.bf16.msra.mxu3 %v1460_v47 }
  0xd4   : > { %649 = vmatmul.bf16.gmra.mxu0 %v1443_v45  ;;  %v1482_v45 = vunpack.c.l.bf16 %v1499_v43 }
  0xe4   : > { %654 = vmatmul.bf16.gmra.mxu0 %v1444_v50 }
  0xf4   : > { %659 = vmatmul.bf16.gmra.mxu0 %v1445_v52 }
 0x121   : > { %v635_v56 = vpop.f32.mrf.mxu0 }
 0x122   : > { %v636_v61 = vadd.f32 %v1466_v58, %v635_v56 }
 0x127   : > { %v665_v63 = vpop.f32.mrf.mxu3 }
 0x128   : > { %v666_v4 = vadd.f32 %v1490_v2, %v665_v63  ;;  %v1456_v63 = vld [vmem:[%s2116_s12] sm:$0xff]  ;;  %v700_v2 = vperm.slane %v2147_v0, 0 }
 0x129   : > { %v637_v60 = vpop.f32.mrf.mxu0 }
 0x12a   : > { %v638_v62 = vadd.f32 %v1467_v59, %v637_v60  ;;  %v1459_v60 = vld [vmem:[%s2116_s12 + $0x18] sm:$0xff] }
 0x12b   : > { %891 = vmatpush.bf16.msra.mxu2 %v1459_v60  ;;  %1523 = vmatpush.bf16.msra.mxu3 %v1459_v60 }
 0x12c   : > { %v676_v1 = vpack.c.bf16 %v638_v62, %v636_v61  ;;  %v1458_v61 = vld [vmem:[%s2116_s12 + $0x10] sm:$0xff]  ;;  %v1457_v62 = vld [vmem:[%s2116_s12 + $0x8] sm:$0xff] }
 0x12e   : > { %757 = vmatmul.bf16.vlgmr.msra.gmra.mxu1 %v676_v1 }
 0x12f   : > { %v667_v6 = vpop.f32.mrf.mxu3  ;;  %892 = vmatpush.bf16.msra.mxu2 %v1458_v61  ;;  %1524 = vmatpush.bf16.msra.mxu3 %v1458_v61 }
 0x130   : > { %v668_v8 = vadd.f32 %v1491_v5, %v667_v6 }
 0x131   : > { %v640_v3 = vpop.f32.mrf.mxu0 }
 0x132   : > { %v682_v11 = vpack.c.bf16 %v668_v8, %v666_v4  ;;  %v641_v13 = vadd.f32 %v1470_v9, %v640_v3 }
 0x133   : > { %893 = vmatpush.bf16.msra.mxu2 %v1457_v62  ;;  %1525 = vmatpush.bf16.msra.mxu3 %v1457_v62 }
 0x134   : > { %787 = vmatmul.bf16.vlgmr.msrb.gmra.mxu3 %v682_v11 }
 0x137   : > { %v670_v15 = vpop.f32.mrf.mxu3  ;;  %894 = vmatpush.bf16.msra.mxu2 %v1456_v63  ;;  %1526 = vmatpush.bf16.msra.mxu3 %v1456_v63 }
 0x138   : > { %v671_v20 = vadd.f32 %v1494_v18, %v670_v15 }
 0x139   : > { %v642_v12 = vpop.f32.mrf.mxu0 }
 0x13a   : > { %v643_v14 = vadd.f32 %v1471_v10, %v642_v12 }
 0x13c   : > { %v677_v17 = vpack.c.bf16 %v643_v14, %v641_v13 }
 0x13e   : > { %762 = vmatmul.bf16.gmra.mxu1 %v677_v17 }
 0x13f   : > { %v672_v22 = vpop.f32.mrf.mxu3 }
 0x140   : > { %v673_v24 = vadd.f32 %v1495_v21, %v672_v22 }
 0x141   : > { %v645_v19 = vpop.f32.mrf.mxu0 }
 0x142   : > { %v683_v27 = vpack.c.bf16 %v673_v24, %v671_v20  ;;  %v646_v29 = vadd.f32 %v1474_v25, %v645_v19 }
 0x144   : > { %792 = vmatmul.bf16.gmra.mxu3 %v683_v27 }
 0x149   : > { %v647_v28 = vpop.f32.mrf.mxu0 }
 0x14a   : > { %v648_v30 = vadd.f32 %v1475_v26, %v647_v28 }
 0x14c   : > { %v678_v31 = vpack.c.bf16 %v648_v30, %v646_v29 }
 0x14e   : > { %767 = vmatmul.bf16.gmra.mxu1 %v678_v31 }
 0x151   : > { %v650_v32 = vpop.f32.mrf.mxu0 }
 0x152   : > { %v651_v37 = vadd.f32 %v1478_v34, %v650_v32 }
 0x159   : > { %v652_v36 = vpop.f32.mrf.mxu0 }
 0x15a   : > { %v653_v38 = vadd.f32 %v1479_v35, %v652_v36 }
 0x15c   : > { %v679_v39 = vpack.c.bf16 %v653_v38, %v651_v37 }
 0x15e   : > { %772 = vmatmul.bf16.gmra.mxu1 %v679_v39 }
 0x161   : > { %v655_v42 = vpop.f32.mrf.mxu0 }
 0x162   : > { %v656_v49 = vadd.f32 %v1482_v45, %v655_v42 }
 0x169   : > { %v657_v48 = vpop.f32.mrf.mxu0 }
 0x16a   : > { %v658_v50 = vadd.f32 %v1483_v46, %v657_v48 }
 0x16c   : > { %v680_v51 = vpack.c.bf16 %v658_v50, %v656_v49 }
 0x16e   : > { %777 = vmatmul.bf16.gmra.mxu1 %v680_v51 }
 0x171   : > { %v660_v52 = vpop.f32.mrf.mxu0 }
 0x172   : > { %v661_v57 = vadd.f32 %v1486_v54, %v660_v52 }
 0x179   : > { %v662_v56 = vpop.f32.mrf.mxu0 }
 0x17a   : > { %v663_v58 = vadd.f32 %v1487_v55, %v662_v56 }
 0x17c   : > { %v681_v59 = vpack.c.bf16 %v663_v58, %v661_v57 }
 0x17e   : > { %782 = vmatmul.bf16.gmra.mxu1 %v681_v59 }
 0x1ab   : > { %v758_v1 = vpop.f32.mrf.mxu1 }
 0x1ac   : > { %v759_v3 = vadd.f32 %v758_v1, %v700_v2 }
 0x1ae   : > { %v798_v6 = vmax.f32 %v759_v3, 0.0 }
 0x1b3   : > { %v760_v4 = vpop.f32.mrf.mxu1 }
 0x1b4   : > { %v761_v5 = vadd.f32 %v760_v4, %v700_v2 }
 0x1b6   : > { %v799_v7 = vmax.f32 %v761_v5, 0.0 }
 0x1b7   : > { %v788_v10 = vpop.f32.mrf.mxu3 }
 0x1b8   : > { %v814_v8 = vpack.c.bf16 %v799_v7, %v798_v6  ;;  %v789_v11 = vadd.f32 %v788_v10, %v700_v2  ;;  %v838_v6 = vperm.slane %v2147_v0, 1 }
 0x1ba   : > { %895 = vmatmul.bf16.vlgmr.msra.gmra.mxu2 %v814_v8  ;;  %v810_v16 = vmax.f32 %v789_v11, 0.0 }
 0x1bb   : > { %v763_v9 = vpop.f32.mrf.mxu1 }
 0x1bc   : > { %v764_v12 = vadd.f32 %v763_v9, %v700_v2 }
 0x1be   : > { %v800_v18 = vmax.f32 %v764_v12, 0.0 }
 0x1bf   : > { %v790_v14 = vpop.f32.mrf.mxu3 }
 0x1c0   : > { %v791_v17 = vadd.f32 %v790_v14, %v700_v2 }
 0x1c2   : > { %v811_v20 = vmax.f32 %v791_v17, 0.0 }
 0x1c3   : > { %v765_v13 = vpop.f32.mrf.mxu1 }
 0x1c4   : > { %v766_v15 = vadd.f32 %v765_v13, %v700_v2  ;;  %v820_v22 = vpack.c.bf16 %v811_v20, %v810_v16 }
 0x1c6   : > { %v801_v19 = vmax.f32 %v766_v15, 0.0  ;;  %925 = vmatmul.bf16.vlgmr.msra.gmra.mxu3 %v820_v22 }
 0x1c7   : > { %v793_v24 = vpop.f32.mrf.mxu3 }
 0x1c8   : > { %v815_v21 = vpack.c.bf16 %v801_v19, %v800_v18  ;;  %v794_v25 = vadd.f32 %v793_v24, %v700_v2 }
 0x1ca   : > { %900 = vmatmul.bf16.gmra.mxu2 %v815_v21  ;;  %v812_v30 = vmax.f32 %v794_v25, 0.0 }
 0x1cb   : > { %v768_v23 = vpop.f32.mrf.mxu1 }
 0x1cc   : > { %v769_v26 = vadd.f32 %v768_v23, %v700_v2 }
 0x1ce   : > { %v802_v32 = vmax.f32 %v769_v26, 0.0 }
 0x1cf   : > { %v795_v28 = vpop.f32.mrf.mxu3 }
 0x1d0   : > { %v796_v31 = vadd.f32 %v795_v28, %v700_v2 }
 0x1d2   : > { %v813_v34 = vmax.f32 %v796_v31, 0.0 }
 0x1d3   : > { %v770_v27 = vpop.f32.mrf.mxu1 }
 0x1d4   : > { %v771_v29 = vadd.f32 %v770_v27, %v700_v2  ;;  %v821_v36 = vpack.c.bf16 %v813_v34, %v812_v30 }
 0x1d6   : > { %v803_v33 = vmax.f32 %v771_v29, 0.0  ;;  %930 = vmatmul.bf16.gmra.mxu3 %v821_v36 }
 0x1d8   : > { %v816_v35 = vpack.c.bf16 %v803_v33, %v802_v32 }
 0x1da   : > { %905 = vmatmul.bf16.gmra.mxu2 %v816_v35 }
 0x1db   : > { %v773_v37 = vpop.f32.mrf.mxu1 }
 0x1dc   : > { %v774_v38 = vadd.f32 %v773_v37, %v700_v2 }
 0x1de   : > { %v804_v41 = vmax.f32 %v774_v38, 0.0 }
 0x1e3   : > { %v775_v39 = vpop.f32.mrf.mxu1 }
 0x1e4   : > { %v776_v40 = vadd.f32 %v775_v39, %v700_v2 }
 0x1e6   : > { %v805_v42 = vmax.f32 %v776_v40, 0.0 }
 0x1e8   : > { %v817_v43 = vpack.c.bf16 %v805_v42, %v804_v41 }
 0x1ea   : > { %910 = vmatmul.bf16.gmra.mxu2 %v817_v43 }
 0x1eb   : > { %v778_v44 = vpop.f32.mrf.mxu1 }
 0x1ec   : > { %v779_v45 = vadd.f32 %v778_v44, %v700_v2 }
 0x1ee   : > { %v806_v48 = vmax.f32 %v779_v45, 0.0 }
 0x1f3   : > { %v780_v46 = vpop.f32.mrf.mxu1 }
 0x1f4   : > { %v781_v47 = vadd.f32 %v780_v46, %v700_v2 }
 0x1f6   : > { %v807_v49 = vmax.f32 %v781_v47, 0.0 }
 0x1f8   : > { %v818_v50 = vpack.c.bf16 %v807_v49, %v806_v48 }
 0x1fa   : > { %915 = vmatmul.bf16.gmra.mxu2 %v818_v50 }
 0x1fb   : > { %v783_v51 = vpop.f32.mrf.mxu1 }
 0x1fc   : > { %v784_v52 = vadd.f32 %v783_v51, %v700_v2 }
 0x1fe   : > { %v808_v55 = vmax.f32 %v784_v52, 0.0 }
 0x203   : > { %v785_v53 = vpop.f32.mrf.mxu1 }
 0x204   : > { %v786_v54 = vadd.f32 %v785_v53, %v700_v2 }
 0x206   : > { %v809_v56 = vmax.f32 %v786_v54, 0.0 }
 0x208   : > { %v819_v57 = vpack.c.bf16 %v809_v56, %v808_v55 }
 0x20a   : > { %920 = vmatmul.bf16.gmra.mxu2 %v819_v57 }
 0x23d   : > { %v896_v58 = vpop.f32.mrf.mxu2 }
 0x23e   : > { %v897_v2 = vadd.f32 %v896_v58, %v838_v6 }
 0x245   : > { %v898_v59 = vpop.f32.mrf.mxu2 }
 0x246   : > { %v899_v8 = vadd.f32 %v898_v59, %v838_v6 }
 0x248   : > { %v952_v14 = vadd.f32 %v899_v8, %v897_v2 }
 0x249   : > { %v926_v4 = vpop.f32.mrf.mxu3 }
 0x24a   : > { %v927_v39 = vadd.f32 %v926_v4, %v838_v6 }
 0x24c   : > { %v948_v46 = vmul.f32 0.0, %v927_v39 }
 0x24d   : > { %v901_v60 = vpop.f32.mrf.mxu2 }
 0x24e   : > { %v902_v7 = vadd.f32 %v901_v60, %v838_v6 }
 0x250   : > { %v938_v10 = vmul.f32 0.0, %v902_v7 }
 0x251   : > { %v928_v12 = vpop.f32.mrf.mxu3 }
 0x252   : > { %v953_v17 = vadd.f32 %v952_v14, %v938_v10  ;;  %v929_v42 = vadd.f32 %v928_v12, %v838_v6 }
 0x254   : > { %v949_v49 = vmul.f32 0.0, %v929_v42 }
 0x255   : > { %v903_v61 = vpop.f32.mrf.mxu2 }
 0x256   : > { %v904_v9 = vadd.f32 %v903_v61, %v838_v6 }
 0x258   : > { %v939_v15 = vmul.f32 0.0, %v904_v9 }
 0x259   : > { %v931_v30 = vpop.f32.mrf.mxu3 }
 0x25a   : > { %v954_v20 = vadd.f32 %v953_v17, %v939_v15  ;;  %v932_v47 = vadd.f32 %v931_v30, %v838_v6 }
 0x25c   : > { %v950_v52 = vmul.f32 0.0, %v932_v47 }
 0x25d   : > { %v906_v62 = vpop.f32.mrf.mxu2 }
 0x25e   : > { %v907_v11 = vadd.f32 %v906_v62, %v838_v6 }
 0x260   : > { %v940_v18 = vmul.f32 0.0, %v907_v11 }
 0x261   : > { %v933_v45 = vpop.f32.mrf.mxu3 }
 0x262   : > { %v955_v23 = vadd.f32 %v954_v20, %v940_v18  ;;  %v934_v50 = vadd.f32 %v933_v45, %v838_v6 }
 0x264   : > { %v951_v54 = vmul.f32 0.0, %v934_v50 }
 0x265   : > { %v908_v63 = vpop.f32.mrf.mxu2 }
 0x266   : > { %v909_v16 = vadd.f32 %v908_v63, %v838_v6 }
 0x268   : > { %v941_v21 = vmul.f32 0.0, %v909_v16 }
 0x26a   : > { %v956_v27 = vadd.f32 %v955_v23, %v941_v21 }
 0x26d   : > { %v911_v1 = vpop.f32.mrf.mxu2 }
 0x26e   : > { %v912_v19 = vadd.f32 %v911_v1, %v838_v6 }
 0x270   : > { %v942_v24 = vmul.f32 0.0, %v912_v19 }
 0x272   : > { %v957_v31 = vadd.f32 %v956_v27, %v942_v24 }
 0x275   : > { %v913_v3 = vpop.f32.mrf.mxu2 }
 0x276   : > { %v914_v22 = vadd.f32 %v913_v3, %v838_v6 }
 0x278   : > { %v943_v28 = vmul.f32 0.0, %v914_v22 }
 0x27a   : > { %v958_v34 = vadd.f32 %v957_v31, %v943_v28 }
 0x27d   : > { %v916_v5 = vpop.f32.mrf.mxu2 }
 0x27e   : > { %v917_v25 = vadd.f32 %v916_v5, %v838_v6 }
 0x280   : > { %v944_v32 = vmul.f32 0.0, %v917_v25 }
 0x282   : > { %v959_v36 = vadd.f32 %v958_v34, %v944_v32 }
 0x285   : > { %v918_v13 = vpop.f32.mrf.mxu2 }
 0x286   : > { %v919_v29 = vadd.f32 %v918_v13, %v838_v6 }
 0x288   : > { %v945_v35 = vmul.f32 0.0, %v919_v29 }
 0x28a   : > { %v960_v40 = vadd.f32 %v959_v36, %v945_v35 }
 0x28d   : > { %v921_v26 = vpop.f32.mrf.mxu2 }
 0x28e   : > { %v922_v33 = vadd.f32 %v921_v26, %v838_v6 }
 0x290   : > { %v946_v37 = vmul.f32 0.0, %v922_v33 }
 0x292   : > { %v961_v43 = vadd.f32 %v960_v40, %v946_v37 }
 0x295   : > { %v923_v38 = vpop.f32.mrf.mxu2 }
 0x296   : > { %v924_v41 = vadd.f32 %v923_v38, %v838_v6 }
 0x298   : > { %v947_v44 = vmul.f32 0.0, %v924_v41 }
 0x29a   : > { %v962_v48 = vadd.f32 %v961_v43, %v947_v44 }
 0x29c   : > { %v963_v51 = vadd.f32 %v962_v48, %v948_v46 }
 0x29e   : > { %v964_v53 = vadd.f32 %v963_v51, %v949_v49 }
 0x2a0   : > { %v965_v55 = vadd.f32 %v964_v53, %v950_v52 }
 0x2a2   : > { %v966_v56 = vadd.f32 %v965_v55, %v951_v54 }
 0x2a4   : > { %v967_v57 = vrot.slane %v966_v56, 4 }
 0x2a6   : > { %v968_v58 = vadd.f32 %v967_v57, %v966_v56 }
 0x2a8   : > { %v969_v59 = vrot.slane %v968_v58, 2 }
 0x2aa   : > { %v970_v60 = vadd.f32 %v969_v59, %v968_v58 }
 0x2ac   : > { %v971_v61 = vrot.slane %v970_v60, 1 }
 0x2ae   : > { %v972_v62 = vadd.f32 %v971_v61, %v970_v60 }
 0x2b0   : > { %v973_v63 = vmul.f32 0.0625, %v972_v62 }
 0x2b2   : > { %v2151_v1 = vsub.f32 %v902_v7, %v973_v63  ;;  %v2153_v3 = vsub.f32 %v897_v2, %v973_v63  ;;  %v2155_v4 = vsub.f32 %v899_v8, %v973_v63  ;;  %v2157_v5 = vsub.f32 %v904_v9, %v973_v63 }
 0x2b3   : > { %v2160_v10 = vsub.f32 %v907_v11, %v973_v63  ;;  %v2166_v14 = vsub.f32 %v909_v16, %v973_v63  ;;  %v2169_v15 = vsub.f32 %v912_v19, %v973_v63  ;;  %v2172_v17 = vsub.f32 %v914_v22, %v973_v63 }
 0x2b4   : > { %v992_v6 = vmul.f32 0.0, %v2151_v1  ;;  %v1006_v12 = vmul.f32 %v2153_v3, %v2153_v3  ;;  %v1007_v13 = vmul.f32 %v2155_v4, %v2155_v4  ;;  %v993_v7 = vmul.f32 0.0, %v2157_v5 }
 0x2b5   : > { %v994_v8 = vmul.f32 0.0, %v2160_v10  ;;  %v995_v11 = vmul.f32 0.0, %v2166_v14  ;;  %v2175_v21 = vsub.f32 %v917_v25, %v973_v63  ;;  %v996_v23 = vmul.f32 0.0, %v2169_v15 }
 0x2b6   : > { %v1008_v2 = vmul.f32 %v992_v6, %v992_v6  ;;  %v1022_v9 = vadd.f32 %v1007_v13, %v1006_v12  ;;  %v1009_v18 = vmul.f32 %v993_v7, %v993_v7  ;;  %v2178_v26 = vsub.f32 %v919_v29, %v973_v63 }
 0x2b7   : > { %v1010_v16 = vmul.f32 %v994_v8, %v994_v8  ;;  %v997_v19 = vmul.f32 0.0, %v2172_v17  ;;  %v1011_v27 = vmul.f32 %v995_v11, %v995_v11  ;;  %v2181_v30 = vsub.f32 %v922_v33, %v973_v63 }
 0x2b8   : > { %v1023_v20 = vadd.f32 %v1022_v9, %v1008_v2  ;;  %v998_v22 = vmul.f32 0.0, %v2175_v21  ;;  %v1012_v31 = vmul.f32 %v996_v23, %v996_v23  ;;  %v2184_v34 = vsub.f32 %v924_v41, %v973_v63 }
 0x2b9   : > { %v999_v25 = vmul.f32 0.0, %v2178_v26  ;;  %v1013_v35 = vmul.f32 %v997_v19, %v997_v19  ;;  %v2187_v37 = vsub.f32 %v927_v39, %v973_v63  ;;  %v1000_v29 = vmul.f32 0.0, %v2181_v30 }
 0x2ba   : > { %v1024_v24 = vadd.f32 %v1023_v20, %v1009_v18  ;;  %v1014_v38 = vmul.f32 %v998_v22, %v998_v22  ;;  %v2190_v43 = vsub.f32 %v929_v42, %v973_v63  ;;  %v1001_v33 = vmul.f32 0.0, %v2184_v34 }
 0x2bb   : > { %v1015_v44 = vmul.f32 %v999_v25, %v999_v25  ;;  %v2193_v46 = vsub.f32 %v932_v47, %v973_v63  ;;  %v1002_v41 = vmul.f32 0.0, %v2187_v37  ;;  %v1016_v48 = vmul.f32 %v1000_v29, %v1000_v29 }
 0x2bc   : > { %v1025_v28 = vadd.f32 %v1024_v24, %v1010_v16  ;;  %v2196_v51 = vsub.f32 %v934_v50, %v973_v63  ;;  %v1003_v39 = vmul.f32 0.0, %v2190_v43  ;;  %v1017_v52 = vmul.f32 %v1001_v33, %v1001_v33 }
 0x2bd   : > { %v1004_v54 = vmul.f32 0.0, %v2193_v46  ;;  %v1018_v42 = vmul.f32 %v1002_v41, %v1002_v41  ;;  %v1071_v22 = vperm.slane %v2147_v0, 2 }
 0x2be   : > { %v1026_v32 = vadd.f32 %v1025_v28, %v1011_v27  ;;  %v1005_v56 = vmul.f32 0.0, %v2196_v51  ;;  %v1019_v57 = vmul.f32 %v1003_v39, %v1003_v39 }
 0x2bf   : > { %v1020_v47 = vmul.f32 %v1004_v54, %v1004_v54 }
 0x2c0   : > { %v1027_v36 = vadd.f32 %v1026_v32, %v1012_v31  ;;  %v1021_v60 = vmul.f32 %v1005_v56, %v1005_v56 }
 0x2c2   : > { %v1028_v40 = vadd.f32 %v1027_v36, %v1013_v35 }
 0x2c4   : > { %v1029_v45 = vadd.f32 %v1028_v40, %v1014_v38 }
 0x2c6   : > { %v1030_v49 = vadd.f32 %v1029_v45, %v1015_v44 }
 0x2c8   : > { %v1031_v53 = vadd.f32 %v1030_v49, %v1016_v48 }
 0x2ca   : > { %v1032_v55 = vadd.f32 %v1031_v53, %v1017_v52 }
 0x2cc   : > { %v1033_v58 = vadd.f32 %v1032_v55, %v1018_v42 }
 0x2ce   : > { %v1034_v59 = vadd.f32 %v1033_v58, %v1019_v57 }
 0x2d0   : > { %v1035_v61 = vadd.f32 %v1034_v59, %v1020_v47 }
 0x2d2   : > { %v1036_v62 = vadd.f32 %v1035_v61, %v1021_v60 }
 0x2d4   : > { %v1037_v6 = vrot.slane %v1036_v62, 4 }
 0x2d6   : > { %v1038_v50 = vadd.f32 %v1037_v6, %v1036_v62 }
 0x2d8   : > { %v1039_v63 = vrot.slane %v1038_v50, 2 }
 0x2da   : > { %v1040_v12 = vadd.f32 %v1039_v63, %v1038_v50 }
 0x2dc   : > { %v1041_v13 = vrot.slane %v1040_v12, 1 }
 0x2de   : > { %v1042_v7 = vadd.f32 %v1041_v13, %v1040_v12 }
 0x2e0   : > { %v1043_v2 = vmul.f32 0.0625, %v1042_v7 }
 0x2e2   : > { %v1044_v8 = vadd.f32 1e-05, %v1043_v2 }
 0x2e4   : > { %1615 = vrsqrt.f32 %v1044_v8  ;;  %vm1051_vm1 = vweird.f32 %v1044_v8 }
 0x2ea   : > { %v1616_v9 = vpop.eup %1615 }
 0x2eb   : > { %v1046_v11 = vmul.f32 %v1616_v9, %v1044_v8  ;;  %vm1052_vm0 = vweird.f32 %v1616_v9 }
 0x2ec   : > { %vm1053_vm2 = vmor %vm1051_vm1, %vm1052_vm0 }
 0x2ed   : > { %v1047_v18 = vmul.f32 %v1616_v9, %v1046_v11 }
 0x2ef   : > { %v1048_v20 = vmul.f32 0.5, %v1047_v18 }
 0x2f1   : > { %v1049_v23 = vsub.f32 1.5, %v1048_v20 }
 0x2f3   : > { %v1050_v16 = vmul.f32 %v1616_v9, %v1049_v23 }
 0x2f5   : > { %v1054_v24 = vsel %vm1053_vm2, %v1616_v9, %v1050_v16 }
 0x2f6   : > { %v1055_v19 = vmul.f32 %v1054_v24, %v2153_v3  ;;  %v1056_v27 = vmul.f32 %v1054_v24, %v2155_v4  ;;  %v1057_v28 = vmul.f32 %v1054_v24, %v2151_v1  ;;  %v1058_v31 = vmul.f32 %v1054_v24, %v2157_v5 }
 0x2f7   : > { %v1061_v32 = vmul.f32 %v1054_v24, %v2169_v15  ;;  %v1062_v25 = vmul.f32 %v1054_v24, %v2172_v17  ;;  %v1059_v35 = vmul.f32 %v1054_v24, %v2160_v10  ;;  %v1060_v36 = vmul.f32 %v1054_v24, %v2166_v14 }
 0x2f8   : > { %v1072_v29 = vmul.f32 %v1071_v22, %v1055_v19  ;;  %v1073_v3 = vmul.f32 %v1071_v22, %v1056_v27  ;;  %v1074_v38 = vmul.f32 %v1071_v22, %v1057_v28  ;;  %v1088_v4 = vperm.slane %v2147_v0, 3 }
 0x2f9   : > { %v1075_v1 = vmul.f32 %v1071_v22, %v1058_v31  ;;  %v1063_v40 = vmul.f32 %v1054_v24, %v2175_v21  ;;  %v1076_v33 = vmul.f32 %v1071_v22, %v1059_v35  ;;  %v1123_v5 = vstv %s1122_s26 }
 0x2fa   : > { %v1064_v15 = vmul.f32 %v1054_v24, %v2178_v26  ;;  %v1065_v17 = vmul.f32 %v1054_v24, %v2181_v30  ;;  %v1077_v44 = vmul.f32 %v1071_v22, %v1060_v36  ;;  %v1078_v10 = vmul.f32 %v1071_v22, %v1061_v32 }
 0x2fb   : > { %v1089_v45 = vadd.f32 %v1088_v4, %v1072_v29  ;;  %v1090_v41 = vadd.f32 %v1088_v4, %v1073_v3  ;;  %v1091_v48 = vadd.f32 %v1088_v4, %v1074_v38  ;;  %v1066_v14 = vmul.f32 %v1054_v24, %v2184_v34 }
 0x2fc   : > { %v1079_v49 = vmul.f32 %v1071_v22, %v1062_v25  ;;  %v1092_v39 = vadd.f32 %v1088_v4, %v1075_v1  ;;  %vm2218_vm3 = vcmp.eq.s32.totalorder %v1123_v5, 1  ;;  %v1067_v21 = vmul.f32 %v1054_v24, %v2187_v37 }
 0x2fd   : > { %v1068_v52 = vmul.f32 %v1054_v24, %v2190_v43  ;;  %v1080_v26 = vmul.f32 %v1071_v22, %v1063_v40  ;;  %v1093_v53 = vadd.f32 %v1088_v4, %v1076_v33  ;;  %v1069_v30 = vmul.f32 %v1054_v24, %v2193_v46 }
 0x2fe   : > { %v1081_v54 = vmul.f32 %v1071_v22, %v1064_v15  ;;  %v1082_v42 = vmul.f32 %v1071_v22, %v1065_v17  ;;  %v1094_v55 = vadd.f32 %v1088_v4, %v1077_v44  ;;  %v1095_v56 = vadd.f32 %v1088_v4, %v1078_v10 }
 0x2ff   : > { %v1106_v57 = vmax.f32 %v1089_v45, 0.0  ;;  %v1107_v34 = vmax.f32 %v1090_v41, 0.0  ;;  %v1108_v58 = vmax.f32 %v1091_v48, 0.0  ;;  %v1070_v47 = vmul.f32 %v1054_v24, %v2196_v51 }
 0x300   : > { %v1083_v59 = vmul.f32 %v1071_v22, %v1066_v14  ;;  %v1096_v60 = vadd.f32 %v1088_v4, %v1079_v49  ;;  %v1109_v61 = vmax.f32 %v1092_v39, 0.0  ;;  %v1084_v62 = vmul.f32 %v1071_v22, %v1067_v21 }
 0x301   : > { %v1085_v37 = vmul.f32 %v1071_v22, %v1068_v52  ;;  %v1097_v6 = vadd.f32 %v1088_v4, %v1080_v26  ;;  %v1110_v43 = vmax.f32 %v1093_v53, 0.0  ;;  %v1086_v50 = vmul.f32 %v1071_v22, %v1069_v30 }
 0x302   : > { %v1098_v63 = vadd.f32 %v1088_v4, %v1081_v54  ;;  %v1099_v12 = vadd.f32 %v1088_v4, %v1082_v42  ;;  %v1111_v46 = vmax.f32 %v1094_v55, 0.0  ;;  %v1112_v13 = vmax.f32 %v1095_v56, 0.0 }
 0x303   : > { %v1125_v7 = vsel %vm2218_vm3, %v1089_v45, %v1106_v57  ;;  %v1126_v2 = vsel %vm2218_vm3, %v1090_v41, %v1107_v34  ;;  %v1127_v51 = vsel %vm2218_vm3, %v1091_v48, %v1108_v58  ;;  %v1087_v8 = vmul.f32 %v1071_v22, %v1070_v47 }
 0x304   : > { %v1100_v9 = vadd.f32 %v1088_v4, %v1083_v59  ;;  %v1113_v11 = vmax.f32 %v1096_v60, 0.0  ;;  %v1128_v18 = vsel %vm2218_vm3, %v1092_v39, %v1109_v61  ;;  %1141 = vst [vmem:[#allocation2 + $0x30] sm:$0xff] %v1125_v7  ;;  %v1101_v20 = vadd.f32 %v1088_v4, %v1084_v62 }
 0x305   : > { %v1114_v23 = vmax.f32 %v1097_v6, 0.0  ;;  %v1129_v16 = vsel %vm2218_vm3, %v1093_v53, %v1110_v43  ;;  %1142 = vst [vmem:[#allocation2] sm:$0xff] %v1126_v2  ;;  %v1102_v24 = vadd.f32 %v1088_v4, %v1085_v37  ;;  %v1115_v19 = vmax.f32 %v1098_v63, 0.0 }
 0x306   : > { %v1130_v27 = vsel %vm2218_vm3, %v1094_v55, %v1111_v46  ;;  %1143 = vst [vmem:[#allocation2 + $0x58] sm:$0xff] %v1127_v51  ;;  %v1103_v28 = vadd.f32 %v1088_v4, %v1086_v50  ;;  %v1116_v22 = vmax.f32 %v1099_v12, 0.0  ;;  %v1131_v31 = vsel %vm2218_vm3, %v1095_v56, %v1112_v13 }
 0x307   : > { %1144 = vst [vmem:[#allocation2 + $0x18] sm:$0xff] %v1128_v18  ;;  %v1104_v32 = vadd.f32 %v1088_v4, %v1087_v8  ;;  %v1117_v25 = vmax.f32 %v1100_v9, 0.0  ;;  %v1132_v35 = vsel %vm2218_vm3, %v1096_v60, %v1113_v11  ;;  %v1118_v36 = vmax.f32 %v1101_v20, 0.0 }
 0x308   : > { %1145 = vst [vmem:[#allocation2 + $0x50] sm:$0xff] %v1129_v16  ;;  %v1133_v29 = vsel %vm2218_vm3, %v1097_v6, %v1114_v23  ;;  %v1119_v3 = vmax.f32 %v1102_v24, 0.0  ;;  %v1134_v38 = vsel %vm2218_vm3, %v1098_v63, %v1115_v19  ;;  %v1120_v1 = vmax.f32 %v1103_v28, 0.0 }
 0x309   : > { %1146 = vst [vmem:[#allocation2 + $0x68] sm:$0xff] %v1130_v27  ;;  %v1135_v40 = vsel %vm2218_vm3, %v1099_v12, %v1116_v22  ;;  %v1121_v4 = vmax.f32 %v1104_v32, 0.0  ;;  %v1136_v33 = vsel %vm2218_vm3, %v1100_v9, %v1117_v25  ;;  %v1137_v5 = vsel %vm2218_vm3, %v1101_v20, %v1118_v36 }
 0x30a   : > { %1147 = vst [vmem:[#allocation2 + $0x8] sm:$0xff] %v1131_v31  ;;  %v1138_v15 = vsel %vm2218_vm3, %v1102_v24, %v1119_v3  ;;  %v1139_v17 = vsel %vm2218_vm3, %v1103_v28, %v1120_v1 }
 0x30b   : > { %1148 = vst [vmem:[#allocation2 + $0x48] sm:$0xff] %v1132_v35  ;;  %v1140_v44 = vsel %vm2218_vm3, %v1104_v32, %v1121_v4 }
 0x30c   : > { %1149 = vst [vmem:[#allocation2 + $0x40] sm:$0xff] %v1133_v29 }
 0x30d   : > { %1150 = vst [vmem:[#allocation2 + $0x20] sm:$0xff] %v1134_v38 }
 0x30e   : > { %1151 = vst [vmem:[#allocation2 + $0x10] sm:$0xff] %v1135_v40 }
 0x30f   : > { %1152 = vst [vmem:[#allocation2 + $0x38] sm:$0xff] %v1136_v33 }
 0x310   : > { %1153 = vst [vmem:[#allocation2 + $0x60] sm:$0xff] %v1137_v5 }
 0x311   : > { %1154 = vst [vmem:[#allocation2 + $0x70] sm:$0xff] %v1138_v15 }
 0x312   : > { %1155 = vst [vmem:[#allocation2 + $0x78] sm:$0xff] %v1139_v17 }
 0x313   : > { %1156 = vst [vmem:[#allocation2 + $0x28] sm:$0xff] %v1140_v44 }
 0x314   : > { %1157 = vst [vmem:[#allocation12] sm:$0xff] %v1125_v7 }
 0x315   : > { %1158 = vst [vmem:[#allocation12 + $0x8] sm:$0xff] %v1126_v2 }
 0x316   : > { %1159 = vst [vmem:[#allocation12 + $0x10] sm:$0xff] %v1127_v51 }
 0x317   : > { %1160 = vst [vmem:[#allocation12 + $0x18] sm:$0xff] %v1128_v18 }
 0x318   : > { %1161 = vst [vmem:[#allocation12 + $0x20] sm:$0xff] %v1129_v16 }
 0x319   : > { %1162 = vst [vmem:[#allocation12 + $0x28] sm:$0xff] %v1130_v27 }
 0x31a   : > { %1163 = vst [vmem:[#allocation12 + $0x30] sm:$0xff] %v1131_v31 }
 0x31b   : > { %1164 = vst [vmem:[#allocation12 + $0x38] sm:$0xff] %v1132_v35 }
 0x31c   : > { %1165 = vst [vmem:[#allocation12 + $0x40] sm:$0xff] %v1133_v29 }
 0x31d   : > { %1166 = vst [vmem:[#allocation12 + $0x48] sm:$0xff] %v1134_v38 }
 0x31e   : > { %1167 = vst [vmem:[#allocation12 + $0x50] sm:$0xff] %v1135_v40 }
 0x31f   : > { %1168 = vst [vmem:[#allocation12 + $0x58] sm:$0xff] %v1136_v33 }
 0x320   : > { %1169 = vst [vmem:[#allocation12 + $0x60] sm:$0xff] %v1137_v5 }
 0x321   : > { %1170 = vst [vmem:[#allocation12 + $0x68] sm:$0xff] %v1138_v15 }
 0x322   : > { %1171 = vst [vmem:[#allocation12 + $0x70] sm:$0xff] %v1139_v17 }
 0x323   : > { %1172 = vst [vmem:[#allocation12 + $0x78] sm:$0xff] %v1140_v44 }
 0x324   : > { %1544 = dma.vmem_to_hbm [thread:$0]  (%p1105_p1), %s1179_s29, 2048, %s1181_s28, [#allocation5], %s1880_s2, %s1880_s2, %s1881_s18  }
 0x325   : > { %1854 = dma.done.wait (%p1105_p1), [#allocation5], 2048  }
 0x326   : > { %1856 = vsyncadd (%p1105_p1), [#allocation5], 4294965248 }
 0x327 PF: > { %s2300_s9 = sld [smem:[#allocation17_spill]]  ;;  %p16_p4 = scmp.ge.s32.totalorder %s1965_s10, 5  }
 0x328   : > { %s2301_s21 = smov %s1863_s22  ;;  %s2302_s22 = smov %s1867_s23 }
 0x329   : > { %s2304_s24 = smov %s1965_s10  ;;  %18 = sbr.rel (!%p16_p4) target bundleno = 7 (0x7), region = 125 }
 0x32d   : > { %s2303_s23 = smov %s2300_s9 }
 0x32e   :  { %1197 = vsyncpa [#allocation4], 1 }
 0x32f   :  { %1199 = vsyncpa [#allocation4 + $0x1], 1 }
 0x330   :  { %1200 = vsyncpa [#allocation7], 1 }
 0x331   :  { %1201 = vsyncpa [#allocation5], 1 }
 0x332   :  { %1203 = vsyncpa [#allocation5 + $0x1], 1 }

</bundles_post_ra>
